<compile_context>
chip_gen: v5e
topology: v5e:2x2
jax: 0.10.0
libtpu: 0.0.40
codegen_flags: <defaults>
</compile_context>

<pallas_src>
import jax
import jax.numpy as jnp
from jax import lax
from jax.experimental import pallas as pl
from jax.experimental.pallas import tpu as pltpu

_VMEM_LIMIT = 48 * 1024 * 1024  # fits v7x (64 MiB) as well as v5e/v6e (128 MiB)


def _batch_tile(bs):
    # Blocked batch dim must equal bs or be a multiple of 8 (sublane tiling).
    if bs % 8 == 0 and bs > 8:
        return 8
    return bs


def _mosaic_params():
    return pltpu.CompilerParams(dimension_semantics=("parallel",),
                                vmem_limit_bytes=_VMEM_LIMIT)


# ----------------------------------------------------------------------------
# Kernel 1: triangular / identity-vector layer (vectorized over batch)
# ----------------------------------------------------------------------------
def _identity_kernel(w_ref, prev_ref, valid_ref):
    tb, S, size_m = w_ref.shape
    a_c, b_c, c_c = 0.075, 0.088, 1.0

    w = w_ref[...]                                              # (tb, S, size_m)
    t = jnp.maximum(
        jnp.minimum((w - a_c) / (b_c - a_c), (c_c - w) / (c_c - b_c)), 0.0)
    iv = jnp.where(t >= 0.6, 2.0, jnp.where(t >= 0.1, 1.0, 0.0))

    # Pairwise identity test via one-hot match counting on the MXU (exact):
    #   matches[b,i,j] == size_m  <=>  iv[b,i,:] == iv[b,j,:] elementwise.
    dn = (((2,), (2,)), ((0,), (0,)))                           # batched i.j over m
    matches = jnp.zeros((tb, S, S), jnp.float32)
    for val in (0.0, 1.0, 2.0):
        plane = (iv == val).astype(jnp.float32)
        matches = matches + lax.dot_general(
            plane, plane, dn, preferred_element_type=jnp.float32)

    i_iota = lax.broadcasted_iota(jnp.int32, (tb, S, S), 1)
    j_iota = lax.broadcasted_iota(jnp.int32, (tb, S, S), 2)
    # Same selection as the reference (dist==0 & j<i, argmax of i*S+j == max j).
    allowed = (matches >= size_m - 0.5) & (j_iota < i_iota)
    prev = jnp.max(jnp.where(allowed, j_iota, -1), axis=2)      # (tb, S)
    valid_ref[...] = (prev >= 0).astype(jnp.int32)
    prev_ref[...] = jnp.maximum(prev, 0)                        # clamp in-range


def skvmn_identity_stage(cw_bsm):
    bs, S, size_m = cw_bsm.shape
    tb = _batch_tile(bs)
    nb = bs // tb
    return pl.pallas_call(
        _identity_kernel,
        out_shape=(jax.ShapeDtypeStruct((bs, S), jnp.int32),
                   jax.ShapeDtypeStruct((bs, S), jnp.int32)),
        grid=(nb,),
        in_specs=[pl.BlockSpec((tb, S, size_m), lambda b: (b, 0, 0))],
        out_specs=(pl.BlockSpec((tb, S), lambda b: (b, 0)),
                   pl.BlockSpec((tb, S), lambda b: (b, 0))),
        compiler_params=_mosaic_params(),
    )(cw_bsm)


# ----------------------------------------------------------------------------
# Kernel 2: DKVMN value-memory recurrence.
# Only the 4 state-dependent matmuls remain in the serial loop; correlation
# weights and the q/x projections arrive precomputed (hoisted big matmuls).
# ----------------------------------------------------------------------------
def _memory_kernel(w_ref, qf_ref, ye_ref, mv0_ref,
                   fwr_ref, awf_ref, eaw_ref, eab_ref,
                   ft_ref, mem_ref):
    S, tb, dim_s = qf_ref.shape
    size_m = mv0_ref.shape[0]

    mem_ref[...] = jnp.broadcast_to(mv0_ref[...][None, :, :], (tb, size_m, dim_s))

    def step(i, carry):
        cw = w_ref[i]                                           # (tb, size_m)
        mem = mem_ref[...]                                      # (tb, size_m, dim_s)
        cwx = cw[:, :, None]
        read = jnp.sum(cwx * mem, axis=1)                       # (tb, dim_s)

        # f = tanh(read @ fWr + [precomputed q @ fWq + fb])
        f = jnp.tanh(jnp.dot(read, fwr_ref[...], preferred_element_type=jnp.float32)
                     + qf_ref[i])
        ft_ref[i] = f

        # write embedding = f @ aWf + [precomputed y @ aWy + ab]
        we = jnp.dot(f, awf_ref[...], preferred_element_type=jnp.float32) + ye_ref[i]
        # erase / add share one fused matmul
        ea = jnp.dot(we, eaw_ref[...], preferred_element_type=jnp.float32) + eab_ref[...]
        erase = jax.nn.sigmoid(ea[:, :dim_s])
        add = jnp.tanh(ea[:, dim_s:])
        mem_ref[...] = (mem * (1.0 - cwx * erase[:, None, :])
                        + cwx * add[:, None, :])
        return carry

    lax.fori_loop(0, S, step, 0)


def skvmn_memory_stage(w_seq, qf_seq, ye_seq, mv0, fwr, awf, eaw, eab):
    S, bs, size_m = w_seq.shape
    dim_s = qf_seq.shape[2]
    tb = _batch_tile(bs)
    nb = bs // tb

    def full(shape):
        return pl.BlockSpec(shape, lambda b: (0,) * len(shape))

    return pl.pallas_call(
        _memory_kernel,
        out_shape=jax.ShapeDtypeStruct((S, bs, dim_s), jnp.float32),
        grid=(nb,),
        in_specs=[pl.BlockSpec((S, tb, size_m), lambda b: (0, b, 0)),
                  pl.BlockSpec((S, tb, dim_s), lambda b: (0, b, 0)),
                  pl.BlockSpec((S, tb, dim_s), lambda b: (0, b, 0)),
                  full((size_m, dim_s)),
                  full((dim_s, dim_s)),
                  full((dim_s, dim_s)),
                  full((dim_s, 2 * dim_s)),
                  full((1, 2 * dim_s))],
        out_specs=pl.BlockSpec((S, tb, dim_s), lambda b: (0, b, 0)),
        scratch_shapes=[pltpu.VMEM((tb, size_m, dim_s), jnp.float32)],
        compiler_params=_mosaic_params(),
    )(w_seq, qf_seq, ye_seq, mv0, fwr, awf, eaw, eab)


# ----------------------------------------------------------------------------
# Kernel 3: LSTM recurrence with hook-ups + prediction head.
# The input-to-hidden projection (ft @ W_ih + b) arrives precomputed; only
# hx @ W_hh remains inside the serial loop.  prev/valid live in SMEM (scalar
# prefetch) and hook-ups load a single (1, dim_s) history row.
# ----------------------------------------------------------------------------
def _lstm_kernel(prev_ref, valid_ref,
                 gih_ref, whh_ref, hx0_ref, cx0_ref, pw_ref, pb_ref,
                 p_ref, h_hist, c_hist):
    S, tb, four_d = gih_ref.shape
    dim_s = four_d // 4
    boff = pl.program_id(0) * tb

    # h_hist / c_hist need no zero-init: any read at index `prev` is either
    # gated off by valid==0 or guaranteed to have been written (prev < i).
    hx0 = jnp.broadcast_to(hx0_ref[...], (tb, dim_s))
    cx0 = jnp.broadcast_to(cx0_ref[...], (tb, dim_s))
    row = lax.broadcasted_iota(jnp.int32, (tb, dim_s), 0)

    def step(i, carry):
        hx, cx = carry
        hooked = None
        for j in range(tb):                                     # tb is small & static
            v = valid_ref[boff + j, i]                          # SMEM scalars
            p = prev_ref[boff + j, i]
            h_row = h_hist[p, pl.ds(j, 1), :]                   # (1, dim_s) row load
            c_row = c_hist[p, pl.ds(j, 1), :]
            vj = v == 1
            hooked = vj if hooked is None else (hooked | vj)
            m = (row == j) & vj
            hx = jnp.where(m, h_row, hx)
            cx = jnp.where(m, c_row, cx)

        # Faithfully reproduce the reference's in-place aliasing: the hook-up
        # mutates hidden_state[i-1] (same tensor object as hx) but never the
        # cell history.  Only store when a hook-up actually happened.
        @pl.when(hooked & (i > 0))
        def _():
            h_hist[i - 1] = hx

        gates = gih_ref[i] + jnp.dot(hx, whh_ref[...],
                                     preferred_element_type=jnp.float32)
        i_g = jax.nn.sigmoid(gates[:, 0 * dim_s:1 * dim_s])
        f_g = jax.nn.sigmoid(gates[:, 1 * dim_s:2 * dim_s])
        g_g = jnp.tanh(gates[:, 2 * dim_s:3 * dim_s])
        o_g = jax.nn.sigmoid(gates[:, 3 * dim_s:4 * dim_s])
        cx_new = f_g * cx + i_g * g_g
        hx_new = o_g * jnp.tanh(cx_new)
        h_hist[i] = hx_new
        c_hist[i] = cx_new
        return (hx_new, cx_new)

    lax.fori_loop(0, S, step, (hx0, cx0))

    # prediction head: sigmoid(h @ pW^T + pb).  Dropout == identity (inference).
    logits = (jnp.sum(h_hist[...] * pw_ref[...][None, :, :], axis=2, keepdims=True)
              + pb_ref[0, 0])
    p_ref[...] = jax.nn.sigmoid(logits)                         # (S, tb, 1)


def skvmn_lstm_stage(prev, valid, gih, whh_t, hx0, cx0, pw, pb):
    S, bs, four_d = gih.shape
    dim_s = four_d // 4
    tb = _batch_tile(bs)
    nb = bs // tb

    grid_spec = pltpu.PrefetchScalarGridSpec(
        num_scalar_prefetch=2,
        grid=(nb,),
        in_specs=[pl.BlockSpec((S, tb, four_d), lambda b, p_, v_: (0, b, 0)),
                  pl.BlockSpec((dim_s, four_d), lambda b, p_, v_: (0, 0)),
                  pl.BlockSpec((1, dim_s), lambda b, p_, v_: (0, 0)),
                  pl.BlockSpec((1, dim_s), lambda b, p_, v_: (0, 0)),
                  pl.BlockSpec((1, dim_s), lambda b, p_, v_: (0, 0)),
                  pl.BlockSpec((1, 1), lambda b, p_, v_: (0, 0))],
        out_specs=pl.BlockSpec((S, tb, 1), lambda b, p_, v_: (0, b, 0)),
        scratch_shapes=[pltpu.VMEM((S, tb, dim_s), jnp.float32),
                        pltpu.VMEM((S, tb, dim_s), jnp.float32)],
    )
    return pl.pallas_call(
        _lstm_kernel,
        out_shape=jax.ShapeDtypeStruct((S, bs, 1), jnp.float32),
        grid_spec=grid_spec,
        compiler_params=_mosaic_params(),
    )(prev, valid, gih, whh_t, hx0, cx0, pw, pb)


# ----------------------------------------------------------------------------
# Forward wrapper (pred_last=True branch of SKVMN.forward)
# ----------------------------------------------------------------------------
def skvmn_forward(params, skills, responses, length):
    q = skills
    r = responses
    masked_r = r * (r > -1).astype(r.dtype)
    q_input, r_input = q, masked_r
    bs, S = q_input.shape
    num_skills, dim_s = params["k_emb"].shape

    x = q_input + num_skills * r_input
    k_emb = params["k_emb"][q_input].astype(jnp.float32)        # (bs, S, dim_s)
    x_emb = params["x_emb"][x].astype(jnp.float32)              # (bs, S, dim_s)

    # --- hoisted, recurrence-independent projections (single large MXU
    #     matmuls instead of 3*S tiny (bs, dim_s) matmuls inside the loop) ---
    mk = params["Mk"].astype(jnp.float32)
    fW = params["fW"].astype(jnp.float32)
    aW = params["aW"].astype(jnp.float32)
    cw = jax.nn.softmax(jnp.einsum("bsd,md->bsm", k_emb, mk), axis=-1)
    qf = jnp.einsum("bsd,ed->bse", k_emb, fW[:, dim_s:]) + params["fb"]
    ye = jnp.einsum("bsd,ed->bse", x_emb, aW[:, dim_s:]) + params["ab"]

    # sequence-major layouts for the recurrence kernel
    w_seq = jnp.transpose(cw, (1, 0, 2))
    qf_seq = jnp.transpose(qf, (1, 0, 2))
    ye_seq = jnp.transpose(ye, (1, 0, 2))

    # triangular / identity layer (independent of the memory recurrence)
    prev, valid = skvmn_identity_stage(cw)                      # (bs, S) int32

    # DKVMN value-memory recurrence
    fwr = fW[:, :dim_s].T
    awf = aW[:, :dim_s].T
    eaw = jnp.concatenate([params["eW"].T, params["adW"].T], axis=1)
    eab = jnp.concatenate([params["eb"], params["adb"]]).reshape(1, 2 * dim_s)
    ft = skvmn_memory_stage(w_seq, qf_seq, ye_seq, params["Mv0"],
                            fwr, awf, eaw, eab)                 # (S, bs, dim_s)

    # hoisted LSTM input-to-hidden projection (one big matmul)
    gih = (jnp.einsum("sbd,hd->sbh", ft, params["w_ih"])
           + (params["b_ih"] + params["b_hh"]))                 # (S, bs, 4*dim_s)

    p3 = skvmn_lstm_stage(prev, valid, gih,
                          params["w_hh"].T, params["hx"], params["cx"],
                          params["pW"], params["pb"].reshape(1, 1))  # (S, bs, 1)

    p = jnp.transpose(p3[:, :, 0])                              # (bs, S)
    pred = p[:, -length:]
    true = r[:, -length:].astype(jnp.float32)
    return {"pred": pred, "true": true}


# ----------------------------------------------------------------------------
# Deterministic parameter init (shapes follow SKVMN.__init__; values synthetic)
# ----------------------------------------------------------------------------
def init_params(key, num_skills, dim_s, size_m):
    ks = jax.random.split(key, 16)
    normal = lambda k, shape, scale: jax.random.normal(k, shape, jnp.float32) * scale
    kaiming = lambda k, shape: normal(k, shape, (2.0 / shape[1]) ** 0.5)
    p = {}
    p["k_emb"] = normal(ks[0], (num_skills, dim_s), 1.0)
    p["x_emb"] = normal(ks[1], (2 * num_skills + 1, dim_s), 1.0)
    p["Mk"] = kaiming(ks[2], (size_m, dim_s))
    p["Mv0"] = kaiming(ks[3], (size_m, dim_s))
    p["fW"] = kaiming(ks[4], (dim_s, 2 * dim_s)); p["fb"] = jnp.zeros((dim_s,), jnp.float32)
    p["aW"] = kaiming(ks[5], (dim_s, 2 * dim_s)); p["ab"] = jnp.zeros((dim_s,), jnp.float32)
    p["eW"] = kaiming(ks[6], (dim_s, dim_s)); p["eb"] = jnp.zeros((dim_s,), jnp.float32)
    p["adW"] = kaiming(ks[7], (dim_s, dim_s)); p["adb"] = jnp.zeros((dim_s,), jnp.float32)
    p["hx"] = kaiming(ks[8], (1, dim_s))
    p["cx"] = kaiming(ks[9], (1, dim_s))
    p["w_ih"] = normal(ks[10], (4 * dim_s, dim_s), dim_s ** -0.5)
    p["w_hh"] = normal(ks[11], (4 * dim_s, dim_s), dim_s ** -0.5)
    p["b_ih"] = jnp.zeros((4 * dim_s,), jnp.float32)
    p["b_hh"] = jnp.zeros((4 * dim_s,), jnp.float32)
    p["pW"] = normal(ks[12], (1, dim_s), dim_s ** -0.5)   # trans=False -> Linear(dim_s, 1)
    p["pb"] = jnp.zeros((1,), jnp.float32)
    return p


if __name__ == "__main__":
    num_skills, dim_s, size_m = 12, 32, 8
    bs, seqlen, length = 2, 8, 1

    params = init_params(jax.random.PRNGKey(0), num_skills, dim_s, size_m)
    kq, kr = jax.random.split(jax.random.PRNGKey(0), 2)
    skills = jax.random.randint(kq, (bs, seqlen), 0, num_skills, dtype=jnp.int32)
    responses = jax.random.randint(kr, (bs, seqlen), 0, 2, dtype=jnp.int32)

    out = skvmn_forward(params, skills, responses, length)
    jax.block_until_ready(out["pred"])
    assert out["pred"].shape == (bs, length) and out["true"].shape == (bs, length)
    print("KERNEL_OK")
</pallas_src>

<mosaic_0001>
module attributes {stable_mosaic.version = 11 : i64} {
  func.func @_identity_kernel(%arg0: i32, %arg1: memref<2x8x8xf32, #tpu.memory_space<vmem>>, %arg2: memref<2x8xi32, #tpu.memory_space<vmem>>, %arg3: memref<2x8xi32, #tpu.memory_space<vmem>>) attributes {dimension_semantics = [#tpu.dimension_semantics<parallel>], iteration_bounds = array<i64: 1>, scalar_prefetch = 0 : i64, scratch_operands = 0 : i64, tpu.core_type = #tpu.core_type<tc>, window_params = [{transform_indices = @transform_0, window_bounds = array<i64: 2, 8, 8>}, {transform_indices = @transform_1, window_bounds = array<i64: 2, 8>}, {transform_indices = @transform_2, window_bounds = array<i64: 2, 8>}]} {
    %c0 = arith.constant 0 : index
    %c0_0 = arith.constant 0 : index
    %c0_1 = arith.constant 0 : index
    %0 = vector.load %arg1[%c0, %c0_0, %c0_1] : memref<2x8x8xf32, #tpu.memory_space<vmem>>, vector<2x8x8xf32>
    %cst = arith.constant 7.500000e-02 : f32
    %1 = vector.broadcast %cst : f32 to vector<2x8x8xf32>
    %2 = arith.subf %0, %1 : vector<2x8x8xf32>
    %cst_2 = arith.constant 1.300000e-02 : f32
    %3 = vector.broadcast %cst_2 : f32 to vector<2x8x8xf32>
    %4 = arith.divf %2, %3 : vector<2x8x8xf32>
    %cst_3 = arith.constant 1.000000e+00 : f32
    %5 = vector.broadcast %cst_3 : f32 to vector<2x8x8xf32>
    %6 = arith.subf %5, %0 : vector<2x8x8xf32>
    %cst_4 = arith.constant 9.120000e-01 : f32
    %7 = vector.broadcast %cst_4 : f32 to vector<2x8x8xf32>
    %8 = arith.divf %6, %7 : vector<2x8x8xf32>
    %9 = arith.minimumf %4, %8 : vector<2x8x8xf32>
    %cst_5 = arith.constant 0.000000e+00 : f32
    %10 = vector.broadcast %cst_5 : f32 to vector<2x8x8xf32>
    %11 = arith.maximumf %9, %10 : vector<2x8x8xf32>
    %cst_6 = arith.constant 6.000000e-01 : f32
    %12 = vector.broadcast %cst_6 : f32 to vector<2x8x8xf32>
    %13 = arith.cmpf oge, %11, %12 : vector<2x8x8xf32>
    %cst_7 = arith.constant 1.000000e-01 : f32
    %14 = vector.broadcast %cst_7 : f32 to vector<2x8x8xf32>
    %15 = arith.cmpf oge, %11, %14 : vector<2x8x8xf32>
    %cst_8 = arith.constant 1.000000e+00 : f32
    %cst_9 = arith.constant 0.000000e+00 : f32
    %16 = vector.broadcast %cst_8 : f32 to vector<2x8x8xf32>
    %17 = vector.broadcast %cst_9 : f32 to vector<2x8x8xf32>
    %18 = arith.select %15, %16, %17 : vector<2x8x8xi1>, vector<2x8x8xf32>
    %cst_10 = arith.constant 2.000000e+00 : f32
    %19 = vector.broadcast %cst_10 : f32 to vector<2x8x8xf32>
    %20 = arith.select %13, %19, %18 : vector<2x8x8xi1>, vector<2x8x8xf32>
    %cst_11 = arith.constant 0.000000e+00 : f32
    %21 = vector.broadcast %cst_11 : f32 to vector<2x8x8xf32>
    %cst_12 = arith.constant 0.000000e+00 : f32
    %22 = vector.broadcast %cst_12 : f32 to vector<2x8x8xf32>
    %23 = arith.cmpf oeq, %20, %22 : vector<2x8x8xf32>
    %24 = arith.extui %23 : vector<2x8x8xi1> to vector<2x8x8xi32>
    %25 = arith.sitofp %24 : vector<2x8x8xi32> to vector<2x8x8xf32>
    %cst_13 = arith.constant dense<0.000000e+00> : vector<2x8x8xf32>
    %26 = tpu.matmul %25, %25, %cst_13 {dimension_numbers = #tpu.dot_dimension_numbers<[2], [2], [1], [1], [0, 0, 0, 1, 1, 1], [0], [0]>} : vector<2x8x8xf32>, vector<2x8x8xf32>, vector<2x8x8xf32> -> vector<2x8x8xf32>
    %27 = arith.addf %21, %26 : vector<2x8x8xf32>
    %cst_14 = arith.constant 1.000000e+00 : f32
    %28 = vector.broadcast %cst_14 : f32 to vector<2x8x8xf32>
    %29 = arith.cmpf oeq, %20, %28 : vector<2x8x8xf32>
    %30 = arith.extui %29 : vector<2x8x8xi1> to vector<2x8x8xi32>
    %31 = arith.sitofp %30 : vector<2x8x8xi32> to vector<2x8x8xf32>
    %cst_15 = arith.constant dense<0.000000e+00> : vector<2x8x8xf32>
    %32 = tpu.matmul %31, %31, %cst_15 {dimension_numbers = #tpu.dot_dimension_numbers<[2], [2], [1], [1], [0, 0, 0, 1, 1, 1], [0], [0]>} : vector<2x8x8xf32>, vector<2x8x8xf32>, vector<2x8x8xf32> -> vector<2x8x8xf32>
    %33 = arith.addf %27, %32 : vector<2x8x8xf32>
    %cst_16 = arith.constant 2.000000e+00 : f32
    %34 = vector.broadcast %cst_16 : f32 to vector<2x8x8xf32>
    %35 = arith.cmpf oeq, %20, %34 : vector<2x8x8xf32>
    %36 = arith.extui %35 : vector<2x8x8xi1> to vector<2x8x8xi32>
    %37 = arith.sitofp %36 : vector<2x8x8xi32> to vector<2x8x8xf32>
    %cst_17 = arith.constant dense<0.000000e+00> : vector<2x8x8xf32>
    %38 = tpu.matmul %37, %37, %cst_17 {dimension_numbers = #tpu.dot_dimension_numbers<[2], [2], [1], [1], [0, 0, 0, 1, 1, 1], [0], [0]>} : vector<2x8x8xf32>, vector<2x8x8xf32>, vector<2x8x8xf32> -> vector<2x8x8xf32>
    %39 = arith.addf %33, %38 : vector<2x8x8xf32>
    %40 = tpu.iota {dimensions = array<i32: 1>} : vector<2x8x8xi32>
    %41 = tpu.iota {dimensions = array<i32: 2>} : vector<2x8x8xi32>
    %cst_18 = arith.constant 7.500000e+00 : f32
    %42 = vector.broadcast %cst_18 : f32 to vector<2x8x8xf32>
    %43 = arith.cmpf oge, %39, %42 : vector<2x8x8xf32>
    %44 = arith.cmpi slt, %41, %40 : vector<2x8x8xi32>
    %45 = arith.andi %43, %44 : vector<2x8x8xi1>
    %c-1_i32 = arith.constant -1 : i32
    %46 = vector.broadcast %c-1_i32 : i32 to vector<2x8x8xi32>
    %47 = arith.select %45, %41, %46 : vector<2x8x8xi1>, vector<2x8x8xi32>
    %cst_19 = arith.constant dense<-2147483648> : vector<2x8xi32>
    %48 = vector.multi_reduction <maxsi>, %47, %cst_19 [2] : vector<2x8x8xi32> to vector<2x8xi32>
    %c0_i32 = arith.constant 0 : i32
    %49 = vector.broadcast %c0_i32 : i32 to vector<2x8xi32>
    %50 = arith.cmpi sge, %48, %49 : vector<2x8xi32>
    %51 = arith.extui %50 : vector<2x8xi1> to vector<2x8xi32>
    %c0_20 = arith.constant 0 : index
    %c0_21 = arith.constant 0 : index
    %52 = vector.load %arg3[%c0_20, %c0_21] : memref<2x8xi32, #tpu.memory_space<vmem>>, vector<2x8xi32>
    tpu.vector_store %arg3[%c0_20, %c0_21], %51 {strides = array<i32>} : memref<2x8xi32, #tpu.memory_space<vmem>>, vector<2x8xi32>,
    %c0_i32_22 = arith.constant 0 : i32
    %53 = vector.broadcast %c0_i32_22 : i32 to vector<2x8xi32>
    %54 = arith.maxsi %48, %53 : vector<2x8xi32>
    %c0_23 = arith.constant 0 : index
    %c0_24 = arith.constant 0 : index
    %55 = vector.load %arg2[%c0_23, %c0_24] : memref<2x8xi32, #tpu.memory_space<vmem>>, vector<2x8xi32>
    tpu.vector_store %arg2[%c0_23, %c0_24], %54 {strides = array<i32>} : memref<2x8xi32, #tpu.memory_space<vmem>>, vector<2x8xi32>,
    return
  }
  func.func @transform_0(%arg0: i32) -> (i32, i32, i32) {
    %c0_i32 = arith.constant 0 : i32
    %c0_i32_0 = arith.constant 0 : i32
    %c0_i32_1 = arith.constant 0 : i32
    return %arg0, %c0_i32, %c0_i32_0 : i32, i32, i32
  }
  func.func @transform_1(%arg0: i32) -> (i32, i32) {
    %c0_i32 = arith.constant 0 : i32
    %c0_i32_0 = arith.constant 0 : i32
    return %arg0, %c0_i32 : i32, i32
  }
  func.func @transform_2(%arg0: i32) -> (i32, i32) {
    %c0_i32 = arith.constant 0 : i32
    %c0_i32_0 = arith.constant 0 : i32
    return %arg0, %c0_i32 : i32, i32
  }
}

</mosaic_0001>

<bundles_post_ra>
// kernel: tpu_custom_call.1
= control target key start
LH: loop header
LB: loop body
LE: loop exit
PB: predicated region body
PF: predicated region fallthrough
CT: control target
= control target key end

     0   :  { %8 = vsyncpa [#allocation3], 0  ;;  %s484_s0 = inlined_call_operand.hbm [shape: f32[2,8,8], index: 0, kind: input, shape index: {}]   ;;  %s485_s1 = inlined_call_operand.hbm [shape: s32[2,8], index: 1, kind: output, shape index: {0}]   ;;  %s486_s2 = inlined_call_operand.hbm [shape: s32[2,8], index: 2, kind: output, shape index: {1}]  }
   0x1   :  { %9 = vsyncpa [#allocation4], 0 }
   0x2   :  { %10 = vsyncpa [#allocation7], 0  ;;  %s15_s11 = sshll.u32 %s484_s0, 4  ;;  %s426_s12 = smov [#allocation2]   ;;  %s16_s11 = int_to_ptr.hbm [resolvable:$true] %s15_s11 }
   0x3   :  { %s17_s13 = sshll.u32 %s426_s12, 4  ;;  %s427_s14 = smov 128   ;;  %s18_s13 = int_to_ptr.vmem [resolvable:$true] %s17_s13 }
   0x4   :  { %s428_s15 = smov 8  }
   0x5   :  { %23 = dma.hbm_to_vmem [thread:$0]  %s16_s11, 256, %s18_s13, [#allocation3], %s427_s14, %s427_s14, %s428_s15  }
   0x6   :  { %420 = dma.done.wait [#allocation3], 256  }
   0x7   :  { %421 = vsyncadd [#allocation3], 4294967040  ;;  %v429_v0 = vmov 0.013   ;;  %v430_v1 = vmov 0.912   ;;  %v223_v41 = vlaneseq }
   0x8   :  { %344 = vrcp.f32 %v429_v0  ;;  %v28_v6 = vld [vmem:[#allocation2] sm:$0xff]  ;;  %v29_v8 = vld [vmem:[#allocation2 + $0x8] sm:$0xff]  ;;  %v431_v28 = vmov 0.0   ;;  %vm76_vm6 = vcmask 64512   ;;  %s433_s0 = smov [#allocation5]   ;;  %s289_s19 = sshll.u32 %s485_s1, 4  ;;  %s290_s19 = int_to_ptr.hbm [resolvable:$true] %s289_s19 }
   0x9   :  { %346 = vrcp.f32 %v430_v1  ;;  %v315_v11 = vadd.f32 -0.075, %v28_v6  ;;  %v316_v13 = vadd.f32 -0.075, %v29_v8  ;;  %v41_v15 = vsub.f32 1.0, %v28_v6  ;;  %s287_s16 = sshll.u32 %s433_s0, 4  ;;  %s288_s16 = int_to_ptr.vmem [resolvable:$true] %s287_s16 }
   0xa   :  { %v42_v16 = vsub.f32 1.0, %v29_v8  ;;  %v224_v42 = vshrl.u32 %v223_v41, 7  ;;  %v465_v43 = vand.u32 127, %v223_v41  ;;  %s434_s20 = smov [#allocation6]   ;;  %s300_s24 = sshll.u32 %s486_s2, 4  ;;  %s301_s24 = int_to_ptr.hbm [resolvable:$true] %s300_s24 }
   0xb   :  { %s298_s21 = sshll.u32 %s434_s20, 4  ;;  %s299_s21 = int_to_ptr.vmem [resolvable:$true] %s298_s21 }
   0xc   :  { %vm229_vm13 = vcmp.lt.s32.totalorder %v465_v43, %v224_v42 }
   0xe   :  { %v345_v2 = vpop.eup %344 }
   0xf   :  { %v347_v3 = vpop.eup %346  ;;  %v33_v4 = vmul.f32 0.013, %v345_v2  ;;  %vm37_vm0 = vweird.f32 %v345_v2 }
  0x10   :  { %v44_v5 = vmul.f32 0.912, %v347_v3  ;;  %vm48_vm1 = vweird.f32 %v347_v3 }
  0x11   :  { %v34_v7 = vsub.f32 1.0, %v33_v4 }
  0x12   :  { %v45_v9 = vsub.f32 1.0, %v44_v5 }
  0x13   :  { %v35_v10 = vmul.f32 %v345_v2, %v34_v7 }
  0x14   :  { %v46_v12 = vmul.f32 %v347_v3, %v45_v9 }
  0x15   :  { %v36_v14 = vadd.f32 %v345_v2, %v35_v10 }
  0x16   :  { %v47_v17 = vadd.f32 %v347_v3, %v46_v12 }
  0x17   :  { %v38_v18 = vsel %vm37_vm0, %v345_v2, %v36_v14  ;;  %v432_v14 = vmov 0  }
  0x18   :  { %v39_v19 = vmul.f32 %v315_v11, %v38_v18  ;;  %v49_v20 = vsel %vm48_vm1, %v347_v3, %v47_v17  ;;  %v40_v21 = vmul.f32 %v316_v13, %v38_v18 }
  0x19   :  { %v50_v22 = vmul.f32 %v49_v20, %v41_v15  ;;  %v51_v23 = vmul.f32 %v49_v20, %v42_v16 }
  0x1b   :  { %v52_v24 = vmin.f32 %v39_v19, %v50_v22  ;;  %v53_v25 = vmin.f32 %v40_v21, %v51_v23 }
  0x1d   :  { %v54_v26 = vmax.f32 %v52_v24, 0.0  ;;  %v55_v27 = vmax.f32 %v53_v25, 0.0 }
  0x1f   :  { %vm56_vm2 = vcmp.ge.f32.partialorder %v54_v26, 0.6  ;;  %vm58_vm3 = vcmp.ge.f32.partialorder %v54_v26, 0.1  ;;  %vm57_vm4 = vcmp.ge.f32.partialorder %v55_v27, 0.6 }
  0x20   :  { %v60_v29 = vsel %vm58_vm3, 1.0, %v431_v28  ;;  %vm59_vm5 = vcmp.ge.f32.partialorder %v55_v27, 0.1 }
  0x21   :  { %v62_v30 = vsel %vm56_vm2, 2.0, %v60_v29  ;;  %v61_v31 = vsel %vm59_vm5, 1.0, %v431_v28 }
  0x22   :  { %vm70_vm7 = vcmp.eq.f32.partialorder %v62_v30, 1.0  ;;  %vm64_vm8 = vcmp.eq.f32.partialorder %v62_v30, 0.0  ;;  %v63_v32 = vsel %vm57_vm4, 2.0, %v61_v31  ;;  %vm169_vm9 = vcmp.eq.f32.partialorder %v62_v30, 2.0 }
  0x23   :  { %v319_v33 = vsel %vm70_vm7, 1.0, %v431_v28  ;;  %v317_v34 = vsel %vm64_vm8, 1.0, %v431_v28  ;;  %vm71_vm10 = vcmp.eq.f32.partialorder %v63_v32, 1.0  ;;  %vm65_vm11 = vcmp.eq.f32.partialorder %v63_v32, 0.0 }
  0x24   :  { %321 = vmatpush.xpose.msk.msra.mxu0 %vm76_vm6, %v319_v33  ;;  %325 = vmatpush.xpose.msk.msra.mxu2 %vm76_vm6, %v317_v34  ;;  %v320_v35 = vsel %vm71_vm10, 1.0, %v431_v28  ;;  %v318_v36 = vsel %vm65_vm11, 1.0, %v431_v28  ;;  %v329_v37 = vsel %vm169_vm9, 1.0, %v431_v28  ;;  %vm170_vm12 = vcmp.eq.f32.partialorder %v63_v32, 2.0 }
  0x25   :  { %323 = vmatpush.xpose.msk.msra.mxu1 %vm76_vm6, %v320_v35  ;;  %327 = vmatpush.xpose.msk.msra.mxu3 %vm76_vm6, %v318_v36  ;;  %v330_v38 = vsel %vm170_vm12, 1.0, %v431_v28  ;;  %vm270_vm8 = vcmask 1041409   ;;  %vm272_vm9 = vcmask 58368  }
  0x27   :  { %322 = vmatmul.msk.f32.vlgmr.msra.gmra.mxu0 %vm76_vm6, %v319_v33  ;;  %326 = vmatmul.msk.f32.vlgmr.msra.gmra.mxu2 %vm76_vm6, %v317_v34 }
  0x28   :  { %331 = vmatpush.xpose.msk.msrb.mxu0 %vm76_vm6, %v329_v37  ;;  %324 = vmatmul.msk.f32.vlgmr.msra.gmra.mxu1 %vm76_vm6, %v320_v35 }
  0x29   :  { %333 = vmatpush.xpose.msk.msrb.mxu1 %vm76_vm6, %v330_v38  ;;  %328 = vmatmul.msk.f32.vlgmr.msra.gmra.mxu3 %vm76_vm6, %v318_v36 }
  0x2f   :  { %332 = vmatmul.msk.f32.vlgmr.msrb.gmra.mxu0 %vm76_vm6, %v329_v37 }
  0x30   :  { %334 = vmatmul.msk.f32.vlgmr.msrb.gmra.mxu1 %vm76_vm6, %v330_v38 }
  0xa4   :  { %v97_v39 = vpop.f32.mrf.mxu0 }
  0xa5   :  { %v120_v40 = vpop.f32.mrf.mxu1 }
  0xaa   :  { %v143_v44 = vpop.f32.mrf.mxu2 }
  0xab   :  { %v144_v45 = vadd.f32 %v143_v44, %v97_v39 }
  0xac   :  { %v166_v46 = vpop.f32.mrf.mxu3  ;;  %v195_v48 = vpop.f32.mrf.mxu0 }
  0xad   :  { %v167_v47 = vadd.f32 %v166_v46, %v120_v40  ;;  %v221_v49 = vadd.f32 %v195_v48, %v144_v45  ;;  %v218_v50 = vpop.f32.mrf.mxu1 }
  0xaf   :  { %v222_v51 = vadd.f32 %v218_v50, %v167_v47  ;;  %vm227_vm14 = vcmp.ge.f32.partialorder %v221_v49, 7.5 }
  0xb0   :  { %vm230_vm15 = vmand %vm227_vm14, %vm229_vm13 }
  0xb1   :  { %vm228_vm0 = vcmp.ge.f32.partialorder %v222_v51, 7.5  ;;  %v232_v52 = vsel %vm230_vm15, %v465_v43, 4294967295 }
  0xb2   :  { %vm231_vm1 = vmand %vm228_vm0, %vm229_vm13  ;;  %v234_v53 = vsel %vm76_vm6, %v232_v52, 2147483648 }
  0xb3   :  { %v233_v54 = vsel %vm231_vm1, %v465_v43, 4294967295  ;;  %v236_v55 = vshra.s32 %v234_v53, 16  ;;  %v235_v60 = vand.u32 65535, %v234_v53 }
  0xb4   :  { %v249_v57 = vsel %vm76_vm6, %v233_v54, 2147483648 }
  0xb5   :  { %v238_v56 = vcvt.s32.f32 %v236_v55  ;;  %v251_v58 = vshra.s32 %v249_v57, 16  ;;  %v237_v62 = vcvt.s32.f32 %v235_v60  ;;  %v250_v0 = vand.u32 65535, %v249_v57 }
  0xb7   :  { %239 = vmax.xlane.f32.xlu0 %v238_v56  ;;  %v253_v59 = vcvt.s32.f32 %v251_v58  ;;  %v252_v2 = vcvt.s32.f32 %v250_v0 }
  0xbf   :  { %254 = vmax.xlane.f32.xlu0 %v253_v59 }
 0x12a   :  { %v240_v61 = vpop.xlane.xlu0 %239 }
 0x12b   :  { %vm241_vm2 = vcmp.eq.f32.partialorder %v238_v56, %v240_v61  ;;  %v246_v4 = vcvt.f32.s32 %v240_v61 }
 0x12c   :  { %v242_v63 = vsel %vm241_vm2, %v237_v62, -inf }
 0x12d   :  { %243 = vmax.xlane.f32.xlu1 %v242_v63  ;;  %v247_v7 = vshll.u32 %v246_v4, 16 }
 0x132   :  { %v255_v1 = vpop.xlane.xlu0 %254 }
 0x133   :  { %vm256_vm3 = vcmp.eq.f32.partialorder %v253_v59, %v255_v1  ;;  %v261_v8 = vcvt.f32.s32 %v255_v1 }
 0x134   :  { %v257_v3 = vsel %vm256_vm3, %v252_v2, -inf }
 0x135   :  { %258 = vmax.xlane.f32.xlu1 %v257_v3  ;;  %v262_v11 = vshll.u32 %v261_v8, 16 }
 0x1a0   :  { %v244_v5 = vpop.xlane.xlu1 %243 }
 0x1a1   :  { %v245_v6 = vcvt.f32.s32 %v244_v5 }
 0x1a3   :  { %v248_v9 = vadd.s32 %v247_v7, %v245_v6 }
 0x1a5   :  { %vm264_vm4 = vcmp.ge.s32.totalorder %v248_v9, 0  ;;  %vm274_vm5 = vcmp.gt.s32.totalorder %v248_v9, 0 }
 0x1a6   :  { %v266_v15 = vsel %vm264_vm4, 1, %v432_v14  ;;  %v275_v16 = vsel %vm274_vm5, %v248_v9, 0 }
 0x1a7   :  { %v268_v19 = vperm.slane %v266_v15, %v465_v43  ;;  %v278_v20 = vperm.slane %v275_v16, %v465_v43 }
 0x1a8   :  { %v259_v10 = vpop.xlane.xlu1 %258 }
 0x1a9   :  { %v260_v12 = vcvt.f32.s32 %v259_v10 }
 0x1ab   :  { %v263_v13 = vadd.s32 %v262_v11, %v260_v12 }
 0x1ad   :  { %vm265_vm6 = vcmp.ge.s32.totalorder %v263_v13, 0  ;;  %vm276_vm7 = vcmp.gt.s32.totalorder %v263_v13, 0 }
 0x1ae   :  { %v267_v17 = vsel %vm265_vm6, 1, %v432_v14  ;;  %v277_v18 = vsel %vm276_vm7, %v263_v13, 0 }
 0x1af   :  { %v269_v21 = vperm.slane %v267_v17, %v465_v43  ;;  %v279_v22 = vperm.slane %v277_v18, %v465_v43 }
 0x1b1   :  { %v280_v23 = vsel %vm270_vm8, %v279_v22, %v278_v20  ;;  %v271_v24 = vsel %vm270_vm8, %v269_v21, %v268_v19 }
 0x1b2   :  { %281 = vst.msk [vmem:[#allocation5] sm:$0x3] %vm272_vm9, %v280_v23 }
 0x1b3   :  { %292 = dma.vmem_to_hbm [thread:$0]  %s288_s16, 32, %s290_s19, [#allocation4]   ;;  %273 = vst.msk [vmem:[#allocation6] sm:$0x3] %vm272_vm9, %v271_v24 }
 0x1b4   :  { %303 = dma.vmem_to_hbm [thread:$0]  %s299_s21, 32, %s301_s24, [#allocation7]  }
 0x1b5   :  { %422 = dma.done.wait [#allocation4], 32  }
 0x1b6   :  { %423 = vsyncadd [#allocation4], 4294967264 }
 0x1b7   :  { %424 = dma.done.wait [#allocation7], 32  }
 0x1b8   :  { %425 = vsyncadd [#allocation7], 4294967264 }
 0x1b9   :  { %312 = vsyncpa [#allocation3], 1 }
 0x1ba   :  { %313 = vsyncpa [#allocation4], 1 }
 0x1bb   :  { %314 = vsyncpa [#allocation7], 1 }

</bundles_post_ra>
